<compile_context>
chip_gen: v7x
topology: tpu7x:2x2x1
jax: 0.10.0
libtpu: 0.0.40
codegen_flags: <defaults>
</compile_context>

<pallas_src>
import functools
import math

import jax
import jax.numpy as jnp
from jax import lax
from jax.experimental import pallas as pl
from jax.experimental.pallas import tpu as pltpu


def _attn_kernel(x_ref, wqkv_ref, bqkv_ref, o_ref, *, mask: bool, lane_dense: bool):
    """One grid step: `Bb` batch elements of single-head (optionally causal) attention.

    x_ref    : (Bb, T, E)  bf16   activation block
    wqkv_ref : (E, 3A)     bf16   fused [Wq*scale | Wk | Wv] (pre-transposed)
    bqkv_ref : (1, 3A)     f32    fused [bq*scale | bk | bv]
    o_ref    : (Bb, T, A)  f32, or (1, T, Bb*A) f32 when lane_dense
    """
    Bb, T, E = x_ref.shape
    A = wqkv_ref.shape[-1] // 3

    # --- fused QKV projection: ONE MXU pass, bf16 operands, f32 accumulate ---
    x2 = x_ref[...].reshape(Bb * T, E)                        # major-dim merge (free)
    qkv = (jnp.dot(x2, wqkv_ref[...], preferred_element_type=jnp.float32)
           + bqkv_ref[...])                                   # (Bb*T, 3A) f32
    qkv = qkv.reshape(Bb, T, 3 * A)

    # 1/sqrt(dk) is already folded into the Wq/bq columns -> no in-kernel scale.
    # TODO(synk): at production sizes make A a multiple of 128 (or 128-align the
    # q/k/v column blocks of wqkv) so these lane slices are free views.
    q = qkv[..., 0 * A:1 * A].astype(jnp.bfloat16)
    k = qkv[..., 1 * A:2 * A].astype(jnp.bfloat16)
    v = qkv[..., 2 * A:3 * A].astype(jnp.bfloat16)

    # --- scores: batched Q @ K^T, contracting the A axis of both (no transpose) ---
    scores = jnp.einsum("bqd,bkd->bqk", q, k,
                        preferred_element_type=jnp.float32)    # (Bb, T, T) f32

    if mask:
        # torch parity: scores.masked_fill_(scores.tril() == 0, -inf)
        # == keep an entry iff it's in the lower triangle AND not exactly 0.0.
        # (If a whole kept row were exactly zero this would NaN — mirrors torch.)
        row = lax.broadcasted_iota(jnp.int32, (T, T), 0)
        col = lax.broadcasted_iota(jnp.int32, (T, T), 1)
        keep = (col <= row) & (scores != 0.0)
        scores = jnp.where(keep, scores, jnp.float32(-jnp.inf))

    # --- numerically stable softmax in f32; EUP reciprocal instead of VALU divide ---
    m = jnp.max(scores, axis=-1, keepdims=True)
    e = jnp.exp(scores - m)
    denom = jnp.sum(e, axis=-1, keepdims=True)
    p = (e * pl.reciprocal(denom, approx=True)).astype(jnp.bfloat16)

    out = jnp.einsum("bqk,bkd->bqd", p, v,
                     preferred_element_type=jnp.float32)       # (Bb, T, A) f32

    if lane_dense:
        # Pack the batch block into lanes: a (T, Bb*A) slab with Bb*A % 128 == 0,
        # so the store is a full-lane (unmasked) vst.  The wrapper un-packs it.
        slab = jnp.concatenate([out[b] for b in range(Bb)], axis=-1)
        o_ref[0] = slab.astype(o_ref.dtype)
    else:
        o_ref[...] = out.astype(o_ref.dtype)


def prepare_qkv_params(wq, bq, wk, bk, wv, bv):
    """Hoisted, call-once weight fusion (do this at module init, not per call).

    Returns (wqkv, bqkv): wqkv (E, 3A) bf16 with 1/sqrt(A) folded into the Wq
    columns; bqkv (1, 3A) f32 with 1/sqrt(A) folded into bq.
    """
    A, E = wq.shape
    scale = 1.0 / math.sqrt(float(A))
    wqkv = jnp.concatenate([wq.T * scale, wk.T, wv.T], axis=1).astype(jnp.bfloat16)
    bqkv = jnp.concatenate([bq * scale, bk, bv]).reshape(1, 3 * A).astype(jnp.float32)
    return wqkv, bqkv


def _pick_block_b(B, T, A, E, *, min_steps=1, vmem_budget_bytes=4 * 1024 * 1024):
    """Pick batch-block size.

    Single-TC parts (v5e/v6e): maximize block_b (per-step overhead ~0.35us, no
    pipelining benefit to preserve).  Prefer block_b with block_b*A % 128 == 0
    so the output store is lane-dense.  On v7x pass min_steps=2 so both
    TensorCores get a grid step.
    """
    candidates = []
    for bb in range(1, B + 1):
        if B % bb != 0 or (B // bb) < min_steps:
            continue
        # rough per-step working set: bf16 x (double-buffered) + f32 qkv/scores/out
        per_step = bb * T * (2 * E * 2 + 3 * A * 4 + T * 4 + 3 * A * 4)
        if per_step > vmem_budget_bytes:
            continue
        candidates.append(bb)
    if not candidates:
        return 1
    dense = [bb for bb in candidates if (bb * A) % 128 == 0]
    return max(dense) if dense else max(candidates)


def single_attention_head_fused(x, wqkv, bqkv, mask, *, block_b=None, min_steps=1):
    """x: (B, T, E) float; wqkv/bqkv from prepare_qkv_params. Returns (B, T, A) f32."""
    B, T, E = x.shape
    A = wqkv.shape[1] // 3

    if block_b is None:
        block_b = _pick_block_b(B, T, A, E, min_steps=min_steps)
    assert B % block_b == 0, "block_b must divide B"
    nb = B // block_b
    lane_dense = (block_b * A) % 128 == 0

    # bf16 MXU operand; also halves the HBM->VMEM bytes for the activations.
    x_bf = x.astype(jnp.bfloat16)

    kernel = functools.partial(_attn_kernel, mask=mask, lane_dense=lane_dense)

    if lane_dense:
        out_shape = jax.ShapeDtypeStruct((nb, T, block_b * A), jnp.float32)
        out_spec = pl.BlockSpec((1, T, block_b * A), lambda i: (i, 0, 0))
    else:
        out_shape = jax.ShapeDtypeStruct((B, T, A), jnp.float32)
        out_spec = pl.BlockSpec((block_b, T, A), lambda i: (i, 0, 0))

    out = pl.pallas_call(
        kernel,
        out_shape=out_shape,
        grid_spec=pltpu.PrefetchScalarGridSpec(
            num_scalar_prefetch=0,
            grid=(nb,),
            in_specs=[
                pl.BlockSpec((block_b, T, E), lambda i: (i, 0, 0)),   # x block
                # Constant index_maps => weights/bias stay VMEM-resident
                # across grid steps (no per-step re-DMA).
                pl.BlockSpec((E, 3 * A), lambda i: (0, 0)),           # Wqkv (bf16)
                pl.BlockSpec((1, 3 * A), lambda i: (0, 0)),           # bqkv (f32)
            ],
            out_specs=out_spec,
        ),
        compiler_params=pltpu.CompilerParams(
            dimension_semantics=("parallel",),
            # Explicit scoped-VMEM limit (raises v5e's 16 MiB default; within
            # v7x's 64 MiB physical) so larger batch blocks still compile.
            vmem_limit_bytes=32 * 1024 * 1024,
        ),
    )(x_bf, wqkv, bqkv)

    if lane_dense:
        # Un-pack the (nb, T, block_b*A) slabs back to (B, T, A): pure wrapper-side
        # layout plumbing (cheap XLA reshape/transpose outside the kernel).
        out = (out.reshape(nb, T, block_b, A)
                  .transpose(0, 2, 1, 3)
                  .reshape(B, T, A))
    return out


def single_attention_head(x, wq, bq, wk, bk, wv, bv, mask, **kw):
    """Convenience wrapper with nn.Linear-style params.  In real use, hoist
    prepare_qkv_params to init instead of paying the fusion per call."""
    wqkv, bqkv = prepare_qkv_params(wq, bq, wk, bk, wv, bv)
    return single_attention_head_fused(x, wqkv, bqkv, mask, **kw)


def _reference(x, wq, bq, wk, bk, wv, bv, mask):
    # Pure-JAX f32 reference mirroring the PyTorch forward exactly.
    q = x @ wq.T + bq
    k = x @ wk.T + bk
    v = x @ wv.T + bv
    scores = jnp.einsum("btd,bsd->bts", q, k) / jnp.sqrt(jnp.float32(wq.shape[0]))
    if mask:
        T = scores.shape[-1]
        tril = jnp.tril(jnp.ones((T, T), dtype=bool))
        tril_scores = jnp.where(tril, scores, 0.0)
        scores = jnp.where(tril_scores == 0.0, -jnp.inf, scores)
    p = jax.nn.softmax(scores, axis=-1)
    return jnp.einsum("bts,bsd->btd", p, v)


if __name__ == "__main__":
    T, E, A = 8, 32, 16

    key = jax.random.PRNGKey(0)
    kx, kq, kbq, kk, kbk, kv, kbv = jax.random.split(key, 7)

    # nn.Linear-style init: U(-1/sqrt(E), 1/sqrt(E)), deterministic.
    bound = 1.0 / math.sqrt(E)
    wq = jax.random.uniform(kq, (A, E), minval=-bound, maxval=bound, dtype=jnp.float32)
    bq = jax.random.uniform(kbq, (A,), minval=-bound, maxval=bound, dtype=jnp.float32)
    wk = jax.random.uniform(kk, (A, E), minval=-bound, maxval=bound, dtype=jnp.float32)
    bk = jax.random.uniform(kbk, (A,), minval=-bound, maxval=bound, dtype=jnp.float32)
    wv = jax.random.uniform(kv, (A, E), minval=-bound, maxval=bound, dtype=jnp.float32)
    bv = jax.random.uniform(kbv, (A,), minval=-bound, maxval=bound, dtype=jnp.float32)

    # Weight fusion hoisted out of the per-call path (done once).
    wqkv, bqkv = prepare_qkv_params(wq, bq, wk, bk, wv, bv)

    # B=8 exercises the lane-dense (8*16 = 128 lanes) output path;
    # B=2 exercises the narrow-output fallback path.
    for B in (8, 2):
        x = jax.random.normal(kx, (B, T, E), dtype=jnp.float32)
        for use_mask in (False, True):
            out = single_attention_head_fused(x, wqkv, bqkv, mask=use_mask)
            out = jax.block_until_ready(out)
            ref = _reference(x, wq, bq, wk, bk, wv, bv, mask=use_mask)
            assert out.shape == (B, T, A)
            # Tolerance covers bf16 MXU operands (x, Wqkv, q/k, p/v) and the EUP
            # approximate-reciprocal softmax normalization vs the f32 reference.
            assert jnp.allclose(out, ref, atol=5e-2, rtol=5e-2), (
                f"mismatch B={B} mask={use_mask}: "
                f"max_err={float(jnp.max(jnp.abs(out - ref)))}")
            assert bool(jnp.all(jnp.isfinite(out)))

    print("KERNEL_OK")
</pallas_src>

<mosaic_0001>
module attributes {stable_mosaic.version = 11 : i64} {
  func.func @_attn_kernel(%arg0: i32, %arg1: memref<8x8x32xbf16, #tpu.memory_space<vmem>>, %arg2: memref<32x48xbf16, #tpu.memory_space<vmem>>, %arg3: memref<1x48xf32, #tpu.memory_space<vmem>>, %arg4: memref<1x8x128xf32, #tpu.memory_space<vmem>>) attributes {dimension_semantics = [#tpu.dimension_semantics<parallel>], iteration_bounds = array<i64: 1>, scalar_prefetch = 0 : i64, scratch_operands = 0 : i64, tpu.core_type = #tpu.core_type<tc>, window_params = [{transform_indices = @transform_0, window_bounds = array<i64: 8, 8, 32>}, {pipeline_mode = #tpu.pipeline_mode<synchronous>, transform_indices = @transform_1, window_bounds = array<i64: 32, 48>}, {pipeline_mode = #tpu.pipeline_mode<synchronous>, transform_indices = @transform_2, window_bounds = array<i64: 1, 48>}, {transform_indices = @transform_3, window_bounds = array<i64: 1, 8, 128>}]} {
    %c0 = arith.constant 0 : index
    %c0_0 = arith.constant 0 : index
    %c0_1 = arith.constant 0 : index
    %0 = vector.load %arg1[%c0, %c0_0, %c0_1] : memref<8x8x32xbf16, #tpu.memory_space<vmem>>, vector<8x8x32xbf16>
    %1 = vector.shape_cast %0 : vector<8x8x32xbf16> to vector<64x32xbf16>
    %c0_2 = arith.constant 0 : index
    %c0_3 = arith.constant 0 : index
    %2 = vector.load %arg2[%c0_2, %c0_3] : memref<32x48xbf16, #tpu.memory_space<vmem>>, vector<32x48xbf16>
    %cst = arith.constant dense<0.000000e+00> : vector<64x48xf32>
    %3 = tpu.matmul %1, %2, %cst {dimension_numbers = #tpu.dot_dimension_numbers<[1], [0], [0], [1], [0, 0, 1, 1], [], []>} : vector<64x32xbf16>, vector<32x48xbf16>, vector<64x48xf32> -> vector<64x48xf32>
    %c0_4 = arith.constant 0 : index
    %c0_5 = arith.constant 0 : index
    %4 = vector.load %arg3[%c0_4, %c0_5] : memref<1x48xf32, #tpu.memory_space<vmem>>, vector<1x48xf32>
    %5 = vector.broadcast %4 : vector<1x48xf32> to vector<64x48xf32>
    %6 = arith.addf %3, %5 : vector<64x48xf32>
    %7 = vector.shape_cast %6 : vector<64x48xf32> to vector<8x8x48xf32>
    %8 = vector.extract_strided_slice %7 {offsets = [0, 0, 0], sizes = [8, 8, 16], strides = [1, 1, 1]} : vector<8x8x48xf32> to vector<8x8x16xf32>
    %9 = arith.truncf %8 : vector<8x8x16xf32> to vector<8x8x16xbf16>
    %10 = vector.extract_strided_slice %7 {offsets = [0, 0, 16], sizes = [8, 8, 16], strides = [1, 1, 1]} : vector<8x8x48xf32> to vector<8x8x16xf32>
    %11 = arith.truncf %10 : vector<8x8x16xf32> to vector<8x8x16xbf16>
    %12 = vector.extract_strided_slice %7 {offsets = [0, 0, 32], sizes = [8, 8, 16], strides = [1, 1, 1]} : vector<8x8x48xf32> to vector<8x8x16xf32>
    %13 = arith.truncf %12 : vector<8x8x16xf32> to vector<8x8x16xbf16>
    "tpu.trace_start"() <{level = 10 : i32, message = "bqd,bkd->bqk"}> : () -> ()
    %cst_6 = arith.constant dense<0.000000e+00> : vector<8x8x8xf32>
    %14 = tpu.matmul %9, %11, %cst_6 {dimension_numbers = #tpu.dot_dimension_numbers<[2], [2], [1], [1], [0, 0, 0, 1, 1, 1], [0], [0]>} : vector<8x8x16xbf16>, vector<8x8x16xbf16>, vector<8x8x8xf32> -> vector<8x8x8xf32>
    "tpu.trace_stop"() : () -> ()
    %cst_7 = arith.constant dense<0xFF800000> : vector<8x8xf32>
    %15 = vector.multi_reduction <maximumf>, %14, %cst_7 [2] : vector<8x8x8xf32> to vector<8x8xf32>
    %16 = vector.shape_cast %15 : vector<8x8xf32> to vector<8x8x1xf32>
    %17 = vector.broadcast %16 : vector<8x8x1xf32> to vector<8x8x8xf32>
    %18 = arith.subf %14, %17 : vector<8x8x8xf32>
    %19 = math.exp %18 : vector<8x8x8xf32>
    %cst_8 = arith.constant dense<0.000000e+00> : vector<8x8xf32>
    %20 = vector.multi_reduction <add>, %19, %cst_8 [2] : vector<8x8x8xf32> to vector<8x8xf32>
    %21 = vector.shape_cast %20 : vector<8x8xf32> to vector<8x8x1xf32>
    %22 = tpu.reciprocal %21 {approx = true} : vector<8x8x1xf32> -> vector<8x8x1xf32>
    %23 = vector.broadcast %22 : vector<8x8x1xf32> to vector<8x8x8xf32>
    %24 = arith.mulf %19, %23 : vector<8x8x8xf32>
    %25 = arith.truncf %24 : vector<8x8x8xf32> to vector<8x8x8xbf16>
    "tpu.trace_start"() <{level = 10 : i32, message = "bqk,bkd->bqd"}> : () -> ()
    %cst_9 = arith.constant dense<0.000000e+00> : vector<8x8x16xf32>
    %26 = tpu.matmul %25, %13, %cst_9 {dimension_numbers = #tpu.dot_dimension_numbers<[2], [1], [1], [2], [0, 0, 0, 1, 1, 2], [0], [0]>} : vector<8x8x8xbf16>, vector<8x8x16xbf16>, vector<8x8x16xf32> -> vector<8x8x16xf32>
    "tpu.trace_stop"() : () -> ()
    %27 = vector.extract_strided_slice %26 {offsets = [0, 0, 0], sizes = [1, 8, 16], strides = [1, 1, 1]} : vector<8x8x16xf32> to vector<1x8x16xf32>
    %28 = vector.shape_cast %27 : vector<1x8x16xf32> to vector<8x16xf32>
    %29 = vector.extract_strided_slice %26 {offsets = [1, 0, 0], sizes = [1, 8, 16], strides = [1, 1, 1]} : vector<8x8x16xf32> to vector<1x8x16xf32>
    %30 = vector.shape_cast %29 : vector<1x8x16xf32> to vector<8x16xf32>
    %31 = vector.extract_strided_slice %26 {offsets = [2, 0, 0], sizes = [1, 8, 16], strides = [1, 1, 1]} : vector<8x8x16xf32> to vector<1x8x16xf32>
    %32 = vector.shape_cast %31 : vector<1x8x16xf32> to vector<8x16xf32>
    %33 = vector.extract_strided_slice %26 {offsets = [3, 0, 0], sizes = [1, 8, 16], strides = [1, 1, 1]} : vector<8x8x16xf32> to vector<1x8x16xf32>
    %34 = vector.shape_cast %33 : vector<1x8x16xf32> to vector<8x16xf32>
    %35 = vector.extract_strided_slice %26 {offsets = [4, 0, 0], sizes = [1, 8, 16], strides = [1, 1, 1]} : vector<8x8x16xf32> to vector<1x8x16xf32>
    %36 = vector.shape_cast %35 : vector<1x8x16xf32> to vector<8x16xf32>
    %37 = vector.extract_strided_slice %26 {offsets = [5, 0, 0], sizes = [1, 8, 16], strides = [1, 1, 1]} : vector<8x8x16xf32> to vector<1x8x16xf32>
    %38 = vector.shape_cast %37 : vector<1x8x16xf32> to vector<8x16xf32>
    %39 = vector.extract_strided_slice %26 {offsets = [6, 0, 0], sizes = [1, 8, 16], strides = [1, 1, 1]} : vector<8x8x16xf32> to vector<1x8x16xf32>
    %40 = vector.shape_cast %39 : vector<1x8x16xf32> to vector<8x16xf32>
    %41 = vector.extract_strided_slice %26 {offsets = [7, 0, 0], sizes = [1, 8, 16], strides = [1, 1, 1]} : vector<8x8x16xf32> to vector<1x8x16xf32>
    %42 = vector.shape_cast %41 : vector<1x8x16xf32> to vector<8x16xf32>
    %43 = tpu.concatenate %28, %30, %32, %34, %36, %38, %40, %42 in 1 : vector<8x16xf32>, vector<8x16xf32>, vector<8x16xf32>, vector<8x16xf32>, vector<8x16xf32>, vector<8x16xf32>, vector<8x16xf32>, vector<8x16xf32> -> vector<8x128xf32>
    %c0_10 = arith.constant 0 : index
    %c0_11 = arith.constant 0 : index
    %c0_12 = arith.constant 0 : index
    %44 = vector.load %arg4[%c0_10, %c0_11, %c0_12] : memref<1x8x128xf32, #tpu.memory_space<vmem>>, vector<1x8x128xf32>
    %45 = vector.shape_cast %44 : vector<1x8x128xf32> to vector<8x128xf32>
    %46 = vector.shape_cast %43 : vector<8x128xf32> to vector<1x8x128xf32>
    tpu.vector_store %arg4[%c0_10, %c0_11, %c0_12], %46 {strides = array<i32>} : memref<1x8x128xf32, #tpu.memory_space<vmem>>, vector<1x8x128xf32>,
    return
  }
  func.func @transform_0(%arg0: i32) -> (i32, i32, i32) {
    %c0_i32 = arith.constant 0 : i32
    %c0_i32_0 = arith.constant 0 : i32
    %c0_i32_1 = arith.constant 0 : i32
    return %arg0, %c0_i32, %c0_i32_0 : i32, i32, i32
  }
  func.func @transform_1(%arg0: i32) -> (i32, i32) {
    %c0_i32 = arith.constant 0 : i32
    %c0_i32_0 = arith.constant 0 : i32
    %c0_i32_1 = arith.constant 0 : i32
    return %c0_i32, %c0_i32_0 : i32, i32
  }
  func.func @transform_2(%arg0: i32) -> (i32, i32) {
    %c0_i32 = arith.constant 0 : i32
    %c0_i32_0 = arith.constant 0 : i32
    %c0_i32_1 = arith.constant 0 : i32
    return %c0_i32, %c0_i32_0 : i32, i32
  }
  func.func @transform_3(%arg0: i32) -> (i32, i32, i32) {
    %c0_i32 = arith.constant 0 : i32
    %c0_i32_0 = arith.constant 0 : i32
    %c0_i32_1 = arith.constant 0 : i32
    return %arg0, %c0_i32, %c0_i32_0 : i32, i32, i32
  }
}

</mosaic_0001>

<bundles_post_ra>
// kernel: tpu_custom_call.1
= control target key start
LH: loop header
LB: loop body
LE: loop exit
PB: predicated region body
PF: predicated region fallthrough
CT: control target
= control target key end

     0   :  { %8 = vsyncpa [#allocation3], 0  ;;  %s1673_s0 = inlined_call_operand.hbm [shape: bf16[8,8,32], index: 0, kind: input, shape index: {}]   ;;  %s1674_s1 = inlined_call_operand.hbm [shape: bf16[32,48], index: 1, kind: input, shape index: {}]   ;;  %s1675_s2 = inlined_call_operand.vmem [shape: f32[1,48], index: 2, kind: input, shape index: {}]   ;;  %s1676_s3 = inlined_call_operand.hbm [shape: f32[1,8,128], index: 3, kind: output, shape index: {}]  }
   0x1   :  { %9 = vsyncpa [#allocation6], 0 }
   0x2   :  { %10 = vsyncpa [#allocation4], 0  ;;  %s1409_s12 = smov [#allocation2]   ;;  %s1337_s16 = scalar_lea.hbm %s1673_s0, 512 }
   0x3   :  { %s16_s13 = sshll.u32 %s1409_s12, 4  ;;  %p1338_p0 = scmp.ne.s32.totalorder %s1673_s0, %s1337_s16  ;;  %s17_s13 = int_to_ptr.vmem [resolvable:$true] %s16_s13 }
   0x4   :  { %p1341_p1 = scmp.lt.u32.totalorder %s1337_s16, %s1673_s0 }
   0x6   :  { %p1343_p2 = pnand %p1341_p1, %p1338_p0 }
   0x8   :  { %1346 = shalt.err (!%p1343_p2)
}
   0x9   :  { %s1347_s21 = scalar_lea.vmem %s17_s13, 512  ;;  %p1352_p4 = scmp.lt.s32.totalorder %s17_s13, %s17_s13 }
   0xa   :  { %p1348_p3 = scmp.ne.s32.totalorder %s17_s13, %s1347_s21  ;;  %p1353_p5 = scmp.lt.s32.totalorder %s1347_s21, %s1347_s21 }
   0xc   :  { %p1354_p6 = por %p1353_p5, %p1352_p4 }
   0xe   :  { %p1355_p7 = pnand %p1354_p6, %p1348_p3 }
  0x10   :  { %1358 = shalt.err (!%p1355_p7)
}
  0x11   :  { %s1410_s22 = smov 64   ;;  %s1411_s23 = smov 4  }
  0x12   :  { %22 = dma.hbm_to_vmem [thread:$0]  %s1673_s0, 512, %s17_s13, [#allocation3], %s1410_s22, %s1410_s22, %s1411_s23  }
  0x13   :  { %s1412_s26 = smov [#allocation5]   ;;  %s1359_s30 = scalar_lea.hbm %s1674_s1, 256 }
  0x14   :  { %s28_s27 = sshll.u32 %s1412_s26, 4  ;;  %p1360_p8 = scmp.ne.s32.totalorder %s1674_s1, %s1359_s30  ;;  %s29_s27 = int_to_ptr.vmem [resolvable:$true] %s28_s27 }
  0x15   :  { %p1363_p9 = scmp.lt.u32.totalorder %s1359_s30, %s1674_s1 }
  0x17   :  { %p1365_p10 = pnand %p1363_p9, %p1360_p8 }
  0x19   :  { %1368 = shalt.err (!%p1365_p10)
}
  0x1a   :  { %s1369_s8 = scalar_lea.vmem %s29_s27, 256  ;;  %p1374_p12 = scmp.lt.s32.totalorder %s29_s27, %s29_s27 }
  0x1b   :  { %p1370_p11 = scmp.ne.s32.totalorder %s29_s27, %s1369_s8  ;;  %p1375_p13 = scmp.lt.s32.totalorder %s1369_s8, %s1369_s8 }
  0x1d   :  { %p1376_p0 = por %p1375_p13, %p1374_p12 }
  0x1f   :  { %p1377_p1 = pnand %p1376_p0, %p1370_p11 }
  0x21   :  { %1380 = shalt.err (!%p1377_p1)
}
  0x22   :  { %34 = dma.hbm_to_vmem [thread:$0]  %s1674_s1, 256, %s29_s27, [#allocation6], %s1410_s22, %s1410_s22, %s1411_s23  }
  0x23   :  { %1403 = dma.done.wait [#allocation3], 512  }
  0x24   :  { %1404 = vsyncadd [#allocation3], 4294966784 }
  0x25   :  { %1405 = dma.done.wait [#allocation6], 256  }
  0x26   :  { %1406 = vsyncadd [#allocation6], 4294967040  ;;  %v1299_v0 = vld [vmem:[#allocation5] sm:$0xff]   ;;  %v1300_v1 = vld [vmem:[#allocation5 + $0x8] sm:$0xff]   ;;  %vm95_vm0 = vcmask 261120   ;;  %v1413_v6 = vmov 0.0  }
  0x27   :  { %1178 = vmatprep.subr.bf16.mxu0 %v1299_v0  ;;  %v1301_v2 = vld [vmem:[#allocation2] sm:$0xff]   ;;  %v1302_v3 = vld [vmem:[#allocation2 + $0x8] sm:$0xff]   ;;  %v1303_v4 = vld [vmem:[#allocation2 + $0x10] sm:$0xff]   ;;  %1190 = vmatprep.subr.bf16.mxu1 %v1413_v6  ;;  %vm1414_vm1 = vmmov 0   ;;  %s1415_s11 = smov 112   ;;  %vm184_vm2 = vcmask 130048  }
  0x28   :  { %1179 = vmatpush3.bf16.msra.mxu0 %v1299_v0  ;;  %1182 = vmatprep.mubr.msk.bf16.mxu0 %vm95_vm0, %v1301_v2  ;;  %v1304_v5 = vld [vmem:[#allocation2 + $0x18] sm:$0xff]   ;;  %v1113_v7 = vld [vmem:[%s1675_s2] ss:$0 sm:$0xff]  ;;  %s1416_s2 = smov 96   ;;  %vm676_vm3 = vcmask 1043456   ;;  %vm574_vm4 = vcmask 64512  }
  0x29   :  { %1180 = vmatprep.subr.bf16.mxu0 %v1300_v1  ;;  %1192 = vmatprep.mubr.msk.bf16.mxu1 %vm1414_vm1, %v1413_v6  ;;  %s1417_s12 = smov 16   ;;  %s1418_s13 = smov 32   ;;  %vm1086_vm5 = vcmask 392192   ;;  %vm1088_vm6 = vcmask 523264   ;;  %vm1090_vm7 = vcmask 654336   ;;  %vm1092_vm8 = vcmask 785408  }
  0x2a   :  { %s1419_s14 = smov 48   ;;  %s1420_s15 = smov 80   ;;  %vm1094_vm9 = vcmask 916480  }
  0x2b   :  { %s1421_s16 = smov [#allocation7]  }
  0x2c   :  { %1181 = vmatpush3.bf16.msra.mxu0 %v1300_v1  ;;  %s1103_s17 = sshll.u32 %s1421_s16, 4  ;;  %s1104_s17 = int_to_ptr.vmem [resolvable:$true] %s1103_s17 }
  0x2d   :  { %1202 = vmatprep.subr.bf16.mxu0 %v1413_v6  ;;  %s1381_s18 = scalar_lea.vmem %s1104_s17, 128  ;;  %p1386_p3 = scmp.lt.s32.totalorder %s1104_s17, %s1104_s17 }
  0x2e   :  { %p1382_p2 = scmp.ne.s32.totalorder %s1104_s17, %s1381_s18  ;;  %p1387_p4 = scmp.lt.s32.totalorder %s1381_s18, %s1381_s18 }
  0x2f   :  { %1183 = vmatmul.mubr.msk.bf16.vlgmr.msra.gmra.mrb[0].mxu0 %vm95_vm0, %v1302_v3 }
  0x30   :  { %1186 = vmatprep.mubr.msk.bf16.mxu0 %vm95_vm0, %v1303_v4  ;;  %p1388_p5 = por %p1387_p4, %p1386_p3 }
  0x32   :  { %p1389_p6 = pnand %p1388_p5, %p1382_p2 }
  0x37   :  { %1187 = vmatmul.mubr.msk.bf16.gmra.mrb[4].mxu0 %vm95_vm0, %v1304_v5 }
  0x38   :  { %1204 = vmatprep.mubr.msk.bf16.mxu0 %vm1414_vm1, %v1413_v6 }
 0x102   :  { %v1184_v8 = vpop.f32.mrb[0].mxu0 }
 0x103   :  { %v151_v9 = vadd.f32 %v1184_v8, %v1113_v7  ;;  %v142_v10 = vpop.f32.mrb[1].mxu0 }
 0x104   :  { %v143_v11 = vadd.f32 %v1113_v7, %v142_v10  ;;  %v1185_v12 = vpop.f32.mrb[2].mxu0 }
 0x105   :  { %v1483_v13 = vpack.c.bf16 %v151_v9, %v151_v9  ;;  %v154_v14 = vadd.f32 %v1185_v12, %v1113_v7  ;;  %v145_v15 = vpop.f32.mrb[3].mxu0 }
 0x106   :  { %v173_v16 = vpack.c.bf16 %v143_v11, %v143_v11  ;;  %v146_v17 = vadd.f32 %v1113_v7, %v145_v15 }
 0x107   :  { %281 = vrot.lane.b32.xlu1 %v1483_v13, %s1415_s11  ;;  %v1488_v18 = vpack.c.bf16 %v154_v14, %v154_v14 }
 0x108   :  { %182 = vrot.lane.b32.xlu0 %v173_v16, %s1415_s11  ;;  %v1490_v19 = vpack.c.bf16 %v146_v17, %v146_v17 }
 0x10a   :  { %v1188_v20 = vpop.f32.mrb[4].mxu0 }
 0x10b   :  { %330 = vrot.lane.b32.xlu1 %v1488_v18, %s1415_s11  ;;  %v158_v21 = vpop.f32.mrb[5].mxu0  ;;  %v167_v22 = vadd.f32 %v1188_v20, %v1113_v7 }
 0x10c   :  { %v159_v23 = vadd.f32 %v1113_v7, %v158_v21  ;;  %v1189_v24 = vpop.f32.mrb[6].mxu0  ;;  %232 = vrot.lane.b32.xlu0 %v1490_v19, %s1415_s11 }
 0x10d   :  { %v161_v25 = vpop.f32.mrb[7].mxu0  ;;  %v170_v27 = vadd.f32 %v1189_v24, %v1113_v7  ;;  %v1498_v29 = vpack.c.bf16 %v167_v22, %v167_v22 }
 0x10e   :  { %v1496_v26 = vpack.c.bf16 %v159_v23, %v159_v23  ;;  %v162_v28 = vadd.f32 %v1113_v7, %v161_v25 }
 0x10f   :  { %v1504_v31 = vpack.c.bf16 %v170_v27, %v170_v27 }
 0x110   :  { %v1500_v30 = vpack.c.bf16 %v162_v28, %v162_v28  ;;  %379 = vrot.lane.b32.xlu0 %v1496_v26, %s1415_s11 }
 0x112   :  { %428 = vrot.lane.b32.xlu1 %v1500_v30, %s1415_s11 }
 0x114   :  { %477 = vrot.lane.b32.xlu0 %v1498_v29, %s1415_s11 }
 0x116   :  { %526 = vrot.lane.b32.xlu1 %v1504_v31, %s1415_s11 }
 0x11a   :  { %671 = vrot.lane.b32.xlu1 %v173_v16, %s1416_s2 }
 0x179   :  { %v282_v32 = vpop.permute.xlu1 %281 }
 0x17a   :  { %v287_v33 = vsel %vm184_vm2, %v282_v32, 0  ;;  %v183_v34 = vpop.permute.xlu0 %182 }
 0x17b   :  { %1203 = vmatpush3.bf16.xpose.msra.mxu0 %v287_v33  ;;  %v189_v35 = vsel %vm184_vm2, %v183_v34, 0 }
 0x17c   :  { %1191 = vmatpush3.bf16.xpose.msra.mxu1 %v189_v35  ;;  %1214 = vmatprep.subr.bf16.mxu0 %v1413_v6 }
 0x17d   :  { %1196 = vmatprep.subr.bf16.mxu1 %v1413_v6  ;;  %v331_v37 = vpop.permute.xlu1 %330 }
 0x17e   :  { %v233_v36 = vpop.permute.xlu0 %232  ;;  %v336_v45 = vsel %vm184_vm2, %v331_v37, 0 }
 0x17f   :  { %v238_v39 = vsel %vm184_vm2, %v233_v36, 0 }
 0x182   :  { %1205 = vmatmul.mubr.msk.bf16.vlgmr.msra.gmra.mrb[8].mxu0 %vm184_vm2, %v1483_v13  ;;  %v380_v38 = vpop.permute.xlu0 %379 }
 0x183   :  { %v385_v40 = vsel %vm184_vm2, %v380_v38, 0  ;;  %1193 = vmatmul.mubr.msk.bf16.vlgmr.msra.gmra.mrb[0].mxu1 %vm184_vm2, %v173_v16  ;;  %1216 = vmatprep.mubr.msk.bf16.mxu0 %vm1414_vm1, %v1413_v6 }
 0x184   :  { %v429_v41 = vpop.permute.xlu1 %428  ;;  %1197 = vmatpush3.bf16.xpose.msra.mxu1 %v238_v39  ;;  %1215 = vmatpush3.bf16.xpose.msra.mxu0 %v385_v40 }
 0x185   :  { %1198 = vmatprep.mubr.msk.bf16.mxu1 %vm1414_vm1, %v1413_v6  ;;  %1208 = vmatprep.subr.bf16.mxu1 %v1413_v6  ;;  %v434_v47 = vsel %vm184_vm2, %v429_v41, 0 }
 0x186   :  { %v478_v42 = vpop.permute.xlu0 %477  ;;  %1226 = vmatprep.subr.bf16.mxu0 %v1413_v6 }
 0x187   :  { %v483_v43 = vsel %vm184_vm2, %v478_v42, 0 }
 0x188   :  { %v527_v44 = vpop.permute.xlu1 %526 }
 0x189   :  { %v532_v49 = vsel %vm184_vm2, %v527_v44, 0 }
 0x18b   :  { %1199 = vmatmul.mubr.msk.bf16.vlgmr.msra.gmra.mrb[4].mxu1 %vm184_vm2, %v1490_v19  ;;  %1217 = vmatmul.mubr.msk.bf16.vlgmr.msra.gmra.mrb[12].mxu0 %vm184_vm2, %v1496_v26 }
 0x18c   :  { %1209 = vmatpush3.bf16.xpose.msra.mxu1 %v336_v45  ;;  %1227 = vmatpush3.bf16.xpose.msra.mxu0 %v483_v43  ;;  %v672_v46 = vpop.permute.xlu1 %671 }
 0x18d   :  { %1210 = vmatprep.mubr.msk.bf16.mxu1 %vm1414_vm1, %v1413_v6  ;;  %1228 = vmatprep.mubr.msk.bf16.mxu0 %vm1414_vm1, %v1413_v6  ;;  %v678_v48 = vsel %vm676_vm3, %v672_v46, 0 }
 0x18e   :  { %1220 = vmatprep.subr.bf16.mxu1 %v1413_v6  ;;  %1238 = vmatprep.subr.bf16.mxu0 %v1413_v6 }
 0x193   :  { %1211 = vmatmul.mubr.msk.bf16.vlgmr.msra.gmra.mrb[8].mxu1 %vm184_vm2, %v1488_v18  ;;  %1229 = vmatmul.mubr.msk.bf16.vlgmr.msra.gmra.mrb[16].mxu0 %vm184_vm2, %v1498_v29 }
 0x194   :  { %1221 = vmatpush3.bf16.xpose.msra.mxu1 %v434_v47  ;;  %1239 = vmatpush3.bf16.msra.mxu0 %v678_v48 }
 0x195   :  { %1222 = vmatprep.mubr.msk.bf16.mxu1 %vm1414_vm1, %v1413_v6  ;;  %1232 = vmatprep.subr.bf16.mxu1 %v1413_v6 }
 0x196   :  { %1240 = vmatprep.mubr.msk.bf16.mxu0 %vm1414_vm1, %v1413_v6  ;;  %1250 = vmatprep.subr.bf16.mxu0 %v1413_v6 }
 0x19b   :  { %1223 = vmatmul.mubr.msk.bf16.vlgmr.msra.gmra.mrb[12].mxu1 %vm184_vm2, %v1500_v30 }
 0x19c   :  { %1233 = vmatpush3.bf16.xpose.msra.mxu1 %v532_v49  ;;  %1234 = vmatprep.mubr.msk.bf16.mxu1 %vm1414_vm1, %v1413_v6 }
 0x19d   :  { %1244 = vmatprep.subr.bf16.mxu1 %v1413_v6 }
 0x1a3   :  { %1235 = vmatmul.mubr.msk.bf16.vlgmr.msra.gmra.mrb[16].mxu1 %vm184_vm2, %v1504_v31 }
 0x1a4   :  { %1246 = vmatprep.mubr.msk.bf16.mxu1 %vm1414_vm1, %v1413_v6 }
 0x255   :  { %v323_v50 = vpop.f32.mrb[8].mxu0 }
 0x256   :  { %v225_v51 = vpop.f32.mrb[0].mxu1  ;;  %v1206_v52 = vpop.f32.mrb[9].mxu0  ;;  %v581_v53 = vsel %vm574_vm4, %v323_v50, -inf }
 0x257   :  { %v326_v54 = vpop.f32.mrb[10].mxu0  ;;  %582 = vmax.xlane.f32.xlu0 %v581_v53  ;;  %v1194_v55 = vpop.f32.mrb[1].mxu1  ;;  %v575_v59 = vsel %vm574_vm4, %v225_v51, -inf }
 0x258   :  { %v228_v56 = vpop.f32.mrb[2].mxu1  ;;  %v1207_v57 = vpop.f32.mrb[11].mxu0 }
 0x259   :  { %v1195_v58 = vpop.f32.mrb[3].mxu1 }
 0x25b   :  { %576 = vmax.xlane.f32.xlu0 %v575_v59 }
 0x25e   :  { %v274_v60 = vpop.f32.mrb[4].mxu1  ;;  %v421_v61 = vpop.f32.mrb[12].mxu0 }
 0x25f   :  { %v1200_v62 = vpop.f32.mrb[5].mxu1  ;;  %v1218_v63 = vpop.f32.mrb[13].mxu0  ;;  %v578_v0 = vsel %vm574_vm4, %v274_v60, -inf  ;;  %v587_v5 = vsel %vm574_vm4, %v421_v61, -inf }
 0x260   :  { %579 = vmax.xlane.f32.xlu1 %v578_v0  ;;  %v277_v1 = vpop.f32.mrb[6].mxu1  ;;  %v424_v2 = vpop.f32.mrb[14].mxu0 }
 0x261   :  { %v1201_v3 = vpop.f32.mrb[7].mxu1  ;;  %v1219_v4 = vpop.f32.mrb[15].mxu0 }
 0x264   :  { %588 = vmax.xlane.f32.xlu1 %v587_v5 }
 0x266   :  { %v372_v7 = vpop.f32.mrb[8].mxu1  ;;  %v1566_v8 = vpop.f32.mrb[16].mxu0 }
 0x267   :  { %v1212_v9 = vpop.f32.mrb[9].mxu1  ;;  %v1230_v10 = vpop.f32.mrb[17].mxu0  ;;  %v584_v11 = vsel %vm574_vm4, %v372_v7, -inf  ;;  %v593_v12 = vsel %vm574_vm4, %v1566_v8, -inf }
 0x268   :  { %585 = vmax.xlane.f32.xlu0 %v584_v11  ;;  %v375_v14 = vpop.f32.mrb[10].mxu1  ;;  %594 = vmax.xlane.f32.xlu1 %v593_v12  ;;  %v522_v15 = vpop.f32.mrb[18].mxu0 }
 0x269   :  { %v1213_v16 = vpop.f32.mrb[11].mxu1  ;;  %v1231_v17 = vpop.f32.mrb[19].mxu0 }
 0x26e   :  { %v1571_v20 = vpop.f32.mrb[12].mxu1 }
 0x26f   :  { %v1224_v21 = vpop.f32.mrb[13].mxu1  ;;  %v590_v22 = vsel %vm574_vm4, %v1571_v20, -inf }
 0x270   :  { %591 = vmax.xlane.f32.xlu0 %v590_v22  ;;  %v473_v23 = vpop.f32.mrb[14].mxu1 }
 0x271   :  { %v1225_v24 = vpop.f32.mrb[15].mxu1 }
 0x276   :  { %v568_v25 = vpop.f32.mrb[16].mxu1 }
 0x277   :  { %v1236_v27 = vpop.f32.mrb[17].mxu1  ;;  %v596_v28 = vsel %vm574_vm4, %v568_v25, -inf }
 0x278   :  { %597 = vmax.xlane.f32.xlu0 %v596_v28  ;;  %v571_v32 = vpop.f32.mrb[18].mxu1 }
 0x279   :  { %v1237_v33 = vpop.f32.mrb[19].mxu1  ;;  %768 = vrot.lane.b32.xlu1 %v1483_v13, %s1416_s2 }
 0x27d   :  { %816 = vrot.lane.b32.xlu1 %v1488_v18, %s1416_s2 }
 0x28e   :  { %720 = vrot.lane.b32.xlu0 %v1490_v19, %s1416_s2 }
 0x2e4   :  { %v583_v34 = vpop.xlane.xlu0 %582 }
 0x2e5   :  { %v601_v35 = vsub.f32 %v323_v50, %v583_v34 }
 0x2e7   :  { %v611_v36 = vmul.f32 1.442695, %v601_v35 }
 0x2e8   :  { %v577_v37 = vpop.xlane.xlu0 %576 }
 0x2e9   :  { %1305 = vpow2.f32 %v611_v36  ;;  %v599_v38 = vsub.f32 %v225_v51, %v577_v37 }
 0x2eb   :  { %v607_v39 = vmul.f32 1.442695, %v599_v38 }
 0x2ed   :  { %1307 = vpow2.f32 %v607_v39  ;;  %v580_v40 = vpop.xlane.xlu1 %579 }
 0x2ee   :  { %v600_v41 = vsub.f32 %v274_v60, %v580_v40 }
 0x2f0   :  { %v609_v42 = vmul.f32 1.442695, %v600_v41 }
 0x2f1   :  { %v589_v43 = vpop.xlane.xlu1 %588 }
 0x2f2   :  { %1309 = vpow2.f32 %v609_v42  ;;  %v603_v13 = vsub.f32 %v421_v61, %v589_v43 }
 0x2f3   :  { %v1582_v44 = vpop.eup %1305 }
 0x2f4   :  { %v615_v18 = vmul.f32 1.442695, %v603_v13  ;;  %v629_v19 = vsel %vm574_vm4, %v1582_v44, 0.0 }
 0x2f5   :  { %630 = vadd.xlane.f32.xlu1 %v629_v19  ;;  %v586_v45 = vpop.xlane.xlu0 %585  ;;  %v595_v60 = vpop.xlane.xlu1 %594 }
 0x2f6   :  { %1311 = vpow2.f32 %v615_v18  ;;  %v602_v46 = vsub.f32 %v372_v7, %v586_v45  ;;  %v605_v61 = vsub.f32 %v1566_v8, %v595_v60 }
 0x2f7   :  { %v1308_v47 = vpop.eup %1307 }
 0x2f8   :  { %v613_v48 = vmul.f32 1.442695, %v602_v46  ;;  %v623_v49 = vsel %vm574_vm4, %v1308_v47, 0.0  ;;  %v619_v62 = vmul.f32 1.442695, %v605_v61 }
 0x2f9   :  { %624 = vadd.xlane.f32.xlu1 %v623_v49  ;;  %v769_v8 = vpop.permute.xlu1 %768 }
 0x2fa   :  { %1313 = vpow2.f32 %v613_v48  ;;  %v774_v22 = vsel %vm676_vm3, %v769_v8, 0 }
 0x2fb   :  { %1315 = vpow2.f32 %v619_v62 }
 0x2fc   :  { %v1310_v50 = vpop.eup %1309 }
 0x2fd   :  { %v626_v51 = vsel %vm574_vm4, %v1310_v50, 0.0  ;;  %v592_v53 = vpop.xlane.xlu0 %591  ;;  %v817_v9 = vpop.permute.xlu1 %816 }
 0x2fe   :  { %627 = vadd.xlane.f32.xlu0 %v626_v51  ;;  %v604_v63 = vsub.f32 %v1571_v20, %v592_v53 }
 0x300   :  { %v1588_v52 = vpop.eup %1311  ;;  %v617_v0 = vmul.f32 1.442695, %v604_v63 }
 0x301   :  { %v635_v54 = vsel %vm574_vm4, %v1588_v52, 0.0 }
 0x302   :  { %636 = vadd.xlane.f32.xlu1 %v635_v54  ;;  %1317 = vpow2.f32 %v617_v0 }
 0x304   :  { %v1592_v55 = vpop.eup %1313 }
 0x305   :  { %v598_v56 = vpop.xlane.xlu0 %597  ;;  %v632_v57 = vsel %vm574_vm4, %v1592_v55, 0.0  ;;  %v1604_v3 = vpop.eup %1315 }
 0x306   :  { %633 = vadd.xlane.f32.xlu0 %v632_v57  ;;  %v606_v1 = vsub.f32 %v568_v25, %v598_v56  ;;  %v822_v25 = vsel %vm676_vm3, %v817_v9, 0 }
 0x308   :  { %v621_v2 = vmul.f32 1.442695, %v606_v1 }
 0x309   :  { %v721_v58 = vpop.permute.xlu0 %720 }
 0x30a   :  { %v726_v59 = vsel %vm676_vm3, %v721_v58, 0  ;;  %1319 = vpow2.f32 %v621_v2 }
 0x30b   :  { %1245 = vmatpush3.bf16.msra.mxu1 %v726_v59 }
 0x30c   :  { %1256 = vmatprep.subr.bf16.mxu1 %v1413_v6  ;;  %v1608_v4 = vpop.eup %1317 }
 0x313   :  { %912 = vrot.lane.b32.xlu1 %v1500_v30, %s1416_s2  ;;  %v641_v30 = vsel %vm574_vm4, %v1604_v3, 0.0 }
 0x314   :  { %v1612_v5 = vpop.eup %1319 }
 0x315   :  { %v644_v7 = vsel %vm574_vm4, %v1612_v5, 0.0 }
 0x31c   :  { %864 = vrot.lane.b32.xlu0 %v1496_v26, %s1416_s2  ;;  %v638_v26 = vsel %vm574_vm4, %v1608_v4, 0.0 }
 0x337   :  { %642 = vadd.xlane.f32.xlu1 %v641_v30 }
 0x33b   :  { %639 = vadd.xlane.f32.xlu0 %v638_v26 }
 0x33f   :  { %645 = vadd.xlane.f32.xlu0 %v644_v7 }
 0x348   :  { %1008 = vrot.lane.b32.xlu1 %v1504_v31, %s1416_s2 }
 0x355   :  { %960 = vrot.lane.b32.xlu0 %v1498_v29, %s1416_s2 }
 0x382   :  { %v631_v10 = vpop.xlane.xlu1 %630 }
 0x386   :  { %v625_v11 = vpop.xlane.xlu1 %624 }
 0x387   :  { %1321 = vrcp.f32 %v625_v11 }
 0x388   :  { %1323 = vrcp.f32 %v631_v10 }
 0x38b   :  { %v628_v12 = vpop.xlane.xlu0 %627 }
 0x38c   :  { %1325 = vrcp.f32 %v628_v12 }
 0x38f   :  { %v637_v14 = vpop.xlane.xlu1 %636 }
 0x390   :  { %1327 = vrcp.f32 %v637_v14 }
 0x391   :  { %v1322_v15 = vpop.eup %1321 }
 0x392   :  { %v655_v16 = vmul.f32 %v1322_v15, %v1308_v47  ;;  %v1324_v21 = vpop.eup %1323 }
 0x393   :  { %v634_v17 = vpop.xlane.xlu0 %633  ;;  %v657_v23 = vmul.f32 %v1324_v21, %v1582_v44  ;;  %v913_v37 = vpop.permute.xlu1 %912 }
 0x394   :  { %v663_v20 = vpack.c.bf16 %v655_v16, %v655_v16  ;;  %1329 = vrcp.f32 %v634_v17  ;;  %v918_v39 = vsel %vm676_vm3, %v913_v37, 0 }
 0x395   :  { %v665_v28 = vpack.c.bf16 %v657_v23, %v657_v23 }
 0x396   :  { %v1326_v31 = vpop.eup %1325  ;;  %1241 = vmatmul.mubr.msk.bf16.vlgmr.msra.gmra.mrb[20].mxu0 %vm574_vm4, %v663_v20 }
 0x397   :  { %v656_v29 = vmul.f32 %v1326_v31, %v1310_v50  ;;  %1251 = vmatpush3.bf16.msra.mxu0 %v774_v22  ;;  %1252 = vmatprep.mubr.msk.bf16.mxu0 %vm1414_vm1, %v1413_v6  ;;  %v865_v27 = vpop.permute.xlu0 %864 }
 0x398   :  { %1262 = vmatprep.subr.bf16.mxu0 %v1413_v6  ;;  %v870_v33 = vsel %vm676_vm3, %v865_v27, 0 }
 0x399   :  { %v664_v24 = vpack.c.bf16 %v656_v29, %v656_v29 }
 0x39a   :  { %v1328_v32 = vpop.eup %1327 }
 0x39b   :  { %1247 = vmatmul.mubr.msk.bf16.vlgmr.msra.gmra.mrb[20].mxu1 %vm574_vm4, %v664_v24  ;;  %v659_v35 = vmul.f32 %v1328_v32, %v1588_v52 }
 0x39c   :  { %1257 = vmatpush3.bf16.msra.mxu1 %v822_v25  ;;  %1258 = vmatprep.mubr.msk.bf16.mxu1 %vm1414_vm1, %v1413_v6 }
 0x39d   :  { %1268 = vmatprep.subr.bf16.mxu1 %v1413_v6  ;;  %v667_v40 = vpack.c.bf16 %v659_v35, %v659_v35 }
 0x39e   :  { %1253 = vmatmul.mubr.msk.bf16.vlgmr.msra.gmra.mrb[24].mxu0 %vm574_vm4, %v665_v28  ;;  %v1330_v34 = vpop.eup %1329 }
 0x39f   :  { %1263 = vmatpush3.bf16.msra.mxu0 %v870_v33  ;;  %1264 = vmatprep.mubr.msk.bf16.mxu0 %vm1414_vm1, %v1413_v6  ;;  %v658_v36 = vmul.f32 %v1330_v34, %v1592_v55 }
 0x3a0   :  { %1274 = vmatprep.subr.bf16.mxu0 %v1413_v6 }
 0x3a1   :  { %v666_v38 = vpack.c.bf16 %v658_v36, %v658_v36 }
 0x3a3   :  { %1259 = vmatmul.mubr.msk.bf16.vlgmr.msra.gmra.mrb[24].mxu1 %vm574_vm4, %v666_v38 }
 0x3a4   :  { %1269 = vmatpush3.bf16.msra.mxu1 %v918_v39  ;;  %1270 = vmatprep.mubr.msk.bf16.mxu1 %vm1414_vm1, %v1413_v6 }
 0x3a5   :  { %1280 = vmatprep.subr.bf16.mxu1 %v1413_v6 }
 0x3a6   :  { %1265 = vmatmul.mubr.msk.bf16.vlgmr.msra.gmra.mrb[28].mxu0 %vm574_vm4, %v667_v40 }
 0x3a7   :  { %1276 = vmatprep.mubr.msk.bf16.mxu0 %vm1414_vm1, %v1413_v6 }
 0x3c4   :  { %v643_v41 = vpop.xlane.xlu1 %642 }
 0x3c5   :  { %1331 = vrcp.f32 %v643_v41 }
 0x3c8   :  { %v640_v42 = vpop.xlane.xlu0 %639  ;;  %v1009_v48 = vpop.permute.xlu1 %1008 }
 0x3c9   :  { %1333 = vrcp.f32 %v640_v42  ;;  %v1014_v51 = vsel %vm676_vm3, %v1009_v48, 0 }
 0x3cc   :  { %v646_v43 = vpop.xlane.xlu0 %645 }
 0x3cd   :  { %1335 = vrcp.f32 %v646_v43 }
 0x3cf   :  { %v1332_v13 = vpop.eup %1331 }
 0x3d0   :  { %v661_v44 = vmul.f32 %v1332_v13, %v1604_v3  ;;  %v961_v18 = vpop.permute.xlu0 %960 }
 0x3d1   :  { %v966_v19 = vsel %vm676_vm3, %v961_v18, 0 }
 0x3d2   :  { %v669_v45 = vpack.c.bf16 %v661_v44, %v661_v44  ;;  %1275 = vmatpush3.bf16.msra.mxu0 %v966_v19 }
 0x3d3   :  { %v1334_v46 = vpop.eup %1333 }
 0x3d4   :  { %v660_v47 = vmul.f32 %v1334_v46, %v1608_v4 }
 0x3d5   :  { %1277 = vmatmul.mubr.msk.bf16.vlgmr.msra.gmra.mrb[32].mxu0 %vm574_vm4, %v669_v45 }
 0x3d6   :  { %v668_v49 = vpack.c.bf16 %v660_v47, %v660_v47 }
 0x3d7   :  { %v1336_v50 = vpop.eup %1335 }
 0x3d8   :  { %1271 = vmatmul.mubr.msk.bf16.vlgmr.msra.gmra.mrb[28].mxu1 %vm574_vm4, %v668_v49  ;;  %v662_v52 = vmul.f32 %v1336_v50, %v1612_v5 }
 0x3d9   :  { %1281 = vmatpush3.bf16.msra.mxu1 %v1014_v51  ;;  %1282 = vmatprep.mubr.msk.bf16.mxu1 %vm1414_vm1, %v1413_v6 }
 0x3da   :  { %v670_v53 = vpack.c.bf16 %v662_v52, %v662_v52 }
 0x3e0   :  { %1283 = vmatmul.mubr.msk.bf16.vlgmr.msra.gmra.mrb[32].mxu1 %vm574_vm4, %v670_v53 }
 0x469   :  { %v714_v54 = vpop.f32.mrb[20].mxu0 }
 0x46a   :  { %v1242_v55 = vpop.f32.mrb[21].mxu0 }
 0x46b   :  { %v717_v56 = vpop.f32.mrb[22].mxu0 }
 0x46c   :  { %v1243_v57 = vpop.f32.mrb[23].mxu0 }
 0x46e   :  { %v762_v58 = vpop.f32.mrb[20].mxu1 }
 0x46f   :  { %1057 = vrot.lane.b32.xlu0 %v762_v58, %s1417_s12  ;;  %v1248_v59 = vpop.f32.mrb[21].mxu1 }
 0x470   :  { %v765_v60 = vpop.f32.mrb[22].mxu1 }
 0x471   :  { %v1249_v61 = vpop.f32.mrb[23].mxu1  ;;  %v810_v62 = vpop.f32.mrb[24].mxu0 }
 0x472   :  { %1061 = vrot.lane.b32.xlu1 %v810_v62, %s1418_s13  ;;  %v1254_v63 = vpop.f32.mrb[25].mxu0 }
 0x473   :  { %v813_v6 = vpop.f32.mrb[26].mxu0 }
 0x474   :  { %v1255_v0 = vpop.f32.mrb[27].mxu0 }
 0x476   :  { %v858_v1 = vpop.f32.mrb[24].mxu1 }
 0x477   :  { %1065 = vrot.lane.b32.xlu0 %v858_v1, %s1419_s14  ;;  %v1260_v2 = vpop.f32.mrb[25].mxu1 }
 0x478   :  { %v861_v3 = vpop.f32.mrb[26].mxu1 }
 0x479   :  { %v906_v30 = vpop.f32.mrb[28].mxu0  ;;  %v1261_v4 = vpop.f32.mrb[27].mxu1 }
 0x47a   :  { %1069 = vrot.lane.b32.xlu1 %v906_v30, %s1410_s22  ;;  %v1266_v26 = vpop.f32.mrb[29].mxu0 }
 0x47b   :  { %v909_v5 = vpop.f32.mrb[30].mxu0 }
 0x47c   :  { %v1267_v7 = vpop.f32.mrb[31].mxu0 }
 0x4a8   :  { %v1002_v8 = vpop.f32.mrb[32].mxu0 }
 0x4a9   :  { %1077 = vrot.lane.b32.xlu1 %v1002_v8, %s1416_s2  ;;  %v1278_v9 = vpop.f32.mrb[33].mxu0 }
 0x4aa   :  { %v1005_v10 = vpop.f32.mrb[34].mxu0 }
 0x4ab   :  { %v954_v11 = vpop.f32.mrb[28].mxu1  ;;  %v1279_v12 = vpop.f32.mrb[35].mxu0 }
 0x4ac   :  { %1073 = vrot.lane.b32.xlu0 %v954_v11, %s1420_s15  ;;  %v1272_v14 = vpop.f32.mrb[29].mxu1 }
 0x4ad   :  { %v957_v15 = vpop.f32.mrb[30].mxu1 }
 0x4ae   :  { %v1273_v16 = vpop.f32.mrb[31].mxu1 }
 0x4b3   :  { %v1050_v17 = vpop.f32.mrb[32].mxu1 }
 0x4b4   :  { %1081 = vrot.lane.b32.xlu0 %v1050_v17, %s1415_s11  ;;  %v1284_v20 = vpop.f32.mrb[33].mxu1 }
 0x4b5   :  { %v1053_v21 = vpop.f32.mrb[34].mxu1 }
 0x4b6   :  { %v1285_v31 = vpop.f32.mrb[35].mxu1 }
 0x4e1   :  { %v1058_v22 = vpop.permute.xlu0 %1057 }
 0x4e2   :  { %v1084_v24 = vsel %vm184_vm2, %v714_v54, %v1058_v22 }
 0x4e4   :  { %v1062_v29 = vpop.permute.xlu1 %1061 }
 0x4e5   :  { %v1085_v27 = vsel %vm95_vm0, %v1084_v24, %v1062_v29 }
 0x4e9   :  { %v1066_v23 = vpop.permute.xlu0 %1065 }
 0x4ea   :  { %v1087_v32 = vsel %vm1086_vm5, %v1085_v27, %v1066_v23 }
 0x4ec   :  { %v1070_v25 = vpop.permute.xlu1 %1069 }
 0x4ed   :  { %v1089_v33 = vsel %vm1088_vm6, %v1087_v32, %v1070_v25 }
 0x51b   :  { %v1078_v35 = vpop.permute.xlu1 %1077 }
 0x51e   :  { %v1074_v28 = vpop.permute.xlu0 %1073 }
 0x51f   :  { %v1091_v34 = vsel %vm1090_vm7, %v1089_v33, %v1074_v28 }
 0x520   :  { %v1093_v36 = vsel %vm1092_vm8, %v1091_v34, %v1078_v35 }
 0x526   :  { %v1082_v37 = vpop.permute.xlu0 %1081 }
 0x527   :  { %v1095_v38 = vsel %vm1094_vm9, %v1093_v36, %v1082_v37 }
 0x528   :  { %1096 = vst [vmem:[#allocation7] sm:$0xff] %v1095_v38 }
 0x529   :  { %1392 = shalt.err (!%p1389_p6)
}
 0x52a   :  { %s1393_s21 = scalar_lea.hbm %s1676_s3, 128 }
 0x52b   :  { %p1394_p7 = scmp.ne.s32.totalorder %s1676_s3, %s1393_s21  ;;  %p1397_p8 = scmp.lt.u32.totalorder %s1393_s21, %s1676_s3 }
 0x52d   :  { %p1399_p9 = pnand %p1397_p8, %p1394_p7 }
 0x52f   :  { %1402 = shalt.err (!%p1399_p9)
}
 0x530   :  { %1106 = dma.vmem_to_hbm [thread:$0]  %s1104_s17, 128, %s1676_s3, [#allocation4]  }
 0x531   :  { %1407 = dma.done.wait [#allocation4], 128  }
 0x532   :  { %1408 = vsyncadd [#allocation4], 4294967168 }
 0x533   :  { %1110 = vsyncpa [#allocation3], 1 }
 0x534   :  { %1111 = vsyncpa [#allocation6], 1 }
 0x535   :  { %1112 = vsyncpa [#allocation4], 1 }

</bundles_post_ra>
